<compile_context>
chip_gen: v6e
topology: v6e:2x2x1
jax: 0.10.0
libtpu: 0.0.40
codegen_flags: <defaults>
</compile_context>

<pallas_src>
import jax
import jax.numpy as jnp
from jax.experimental import pallas as pl
from jax.experimental.pallas import tpu as pltpu


def _round_up(x, m):
    return (x + m - 1) // m * m


def dan_kernel(x_ref, emb_ref, w1_ref, b1_ref, w2_ref, b2_ref, o_ref, acc_ref):
    """One (vocab tile v [outer, reduction], batch tile i [inner, parallel]) step.

    x_ref   : (TB, S)  int32  token ids for batch tile i
    emb_ref : (TV, Ep) bf16   vocab tile of the padded embedding table
    w1_ref  : (Ep, Hp) bf16   fc1 weight (in x out)
    b1_ref  : (1, Hp)  f32    fc1 bias row
    w2_ref  : (Hp, Np) bf16   fc2 weight (padded to 128 output lanes)
    b2_ref  : (1, Np)  f32    fc2 bias row
    o_ref   : (TB, Np) f32    lane-dense padded output block
    acc_ref : (Bp, Ep) f32    full-batch accumulator (persists across the grid)
    """
    v = pl.program_id(0)          # vocab tile index (outer, reduction)
    i = pl.program_id(1)          # batch tile index (inner, parallel)
    nv = pl.num_programs(0)
    TB, S = x_ref.shape
    TV = emb_ref.shape[0]

    # Tile-relative token ids: a single (TB, S) int op per grid step.
    ids_local = x_ref[...] - v * TV                                        # (TB, S)
    # Hoisted 2-D iota over the vocab-tile lanes (no 3-D iota).
    vocab_iota = jax.lax.broadcasted_iota(jnp.int32, (1, TV), 1)           # (1, TV)

    # Token-count histogram, one sequence column at a time: only the (TB, TV)
    # f32 running sum plus one transient (TB, TV) mask is ever live.
    counts = jnp.zeros((TB, TV), jnp.float32)
    for s in range(S):            # static loop; S is small for DAN inputs
        col = ids_local[:, s:s + 1]                                        # (TB, 1)
        counts = counts + (col == vocab_iota).astype(jnp.float32)
    # TODO(synk): for very long sequences, move S-chunks onto an extra grid axis
    #             instead of this static loop to bound trace size.

    # bf16 represents the integer counts exactly only up to 256 repeats; keep
    # f32 MXU operands beyond that.  Single cast, right before the matmul.
    mxu_dtype = jnp.bfloat16 if S <= 256 else jnp.float32
    partial = jnp.dot(counts.astype(mxu_dtype), emb_ref[...].astype(mxu_dtype),
                      preferred_element_type=jnp.float32)                  # (TB, Ep)

    # Accumulate this batch tile's embedding sum; the table is streamed once
    # because the emb block index is constant across the inner batch axis.
    row = pl.ds(pl.multiple_of(i * TB, TB), TB)

    @pl.when(v == 0)
    def _():
        acc_ref[row, :] = partial

    @pl.when(v > 0)
    def _():
        acc_ref[row, :] = acc_ref[row, :] + partial

    # Finalize once per batch tile after the last vocab tile.
    @pl.when(v == nv - 1)
    def _():
        avg = acc_ref[row, :] * (1.0 / S)                                  # mean over seq (f32)
        h = jnp.dot(avg.astype(jnp.bfloat16), w1_ref[...],
                    preferred_element_type=jnp.float32) + b1_ref[...]      # (TB, Hp)
        h = jnp.maximum(h, 0.0)                                            # ReLU in f32 (VPU)
        logits = jnp.dot(h.astype(jnp.bfloat16), w2_ref[...],
                         preferred_element_type=jnp.float32) + b2_ref[...] # (TB, Np)
        o_ref[...] = jax.nn.sigmoid(logits)                                # lane-dense store


def prepare_params(emb, w1, b1, w2, b2, *, vocab_tile=1024):
    """Pad + cast the embedding table / weights ONCE (reused across forwards)."""
    V, E = emb.shape
    H = w1.shape[1]
    n_out = w2.shape[1]

    TV = min(vocab_tile, _round_up(V, 128))
    Vp = _round_up(V, TV)
    Ep = _round_up(E, 128)
    Hp = _round_up(H, 128)
    Np = _round_up(n_out, 128)

    emb_p = jnp.zeros((Vp, Ep), jnp.bfloat16).at[:V, :E].set(emb.astype(jnp.bfloat16))
    w1_p = jnp.zeros((Ep, Hp), jnp.bfloat16).at[:E, :H].set(w1.astype(jnp.bfloat16))
    b1_p = jnp.zeros((1, Hp), jnp.float32).at[0, :H].set(b1.astype(jnp.float32))
    w2_p = jnp.zeros((Hp, Np), jnp.bfloat16).at[:H, :n_out].set(w2.astype(jnp.bfloat16))
    b2_p = jnp.zeros((1, Np), jnp.float32).at[0, :n_out].set(b2.astype(jnp.float32))
    return dict(emb=emb_p, w1=w1_p, b1=b1_p, w2=w2_p, b2=b2_p,
                vocab_tile=TV, n_out=n_out)


def nn2dan_forward(x, params, *, batch_tile=None):
    """NN2DAN forward. x: (B, S) integer token ids. Returns (B, 2) float32."""
    emb_p, w1_p, b1_p, w2_p, b2_p = (params["emb"], params["w1"], params["b1"],
                                     params["w2"], params["b2"])
    TV = params["vocab_tile"]
    n_out = params["n_out"]

    B, S = x.shape
    Vp, Ep = emb_p.shape
    Hp = w1_p.shape[1]
    Np = w2_p.shape[1]

    # 128 fills v5e's 128-wide MXU; 256 fills the 256-wide MXU on v6e/v7x while
    # still leaving >= 2 batch tiles (v7x megacore) once B >= 512.
    if batch_tile is None:
        batch_tile = 256 if B >= 512 else 128
    TB = min(batch_tile, _round_up(B, 8))
    Bp = _round_up(B, TB)
    nb = Bp // TB
    nv = Vp // TV

    x_p = jnp.zeros((Bp, S), jnp.int32).at[:B, :].set(x.astype(jnp.int32))

    cost = pl.CostEstimate(
        flops=int(2 * Bp * Vp * Ep + 2 * Bp * Ep * Hp + 2 * Bp * Hp * Np),
        transcendentals=int(Bp * Np),
        bytes_accessed=int(Vp * Ep * 2 + Ep * Hp * 2 + Hp * Np * 2
                           + Bp * S * 4 + Bp * Np * 4 + (Hp + Np) * 4),
    )

    # Vocab (reduction) is the OUTER grid axis so the embedding table is
    # streamed from HBM exactly once per forward, independent of the number of
    # batch tiles; batch is the inner "parallel" axis.  Per-batch-tile partial
    # sums persist in the full-batch f32 VMEM accumulator scratch.
    out_padded = pl.pallas_call(
        dan_kernel,
        out_shape=jax.ShapeDtypeStruct((Bp, Np), jnp.float32),
        grid=(nv, nb),
        in_specs=[
            pl.BlockSpec((TB, S), lambda v, i: (i, 0)),    # token ids
            pl.BlockSpec((TV, Ep), lambda v, i: (v, 0)),   # embedding vocab tile
            pl.BlockSpec((Ep, Hp), lambda v, i: (0, 0)),   # fc1 weight (constant)
            pl.BlockSpec((1, Hp), lambda v, i: (0, 0)),    # fc1 bias (constant)
            pl.BlockSpec((Hp, Np), lambda v, i: (0, 0)),   # fc2 weight (constant)
            pl.BlockSpec((1, Np), lambda v, i: (0, 0)),    # fc2 bias (constant)
        ],
        out_specs=pl.BlockSpec((TB, Np), lambda v, i: (i, 0)),
        scratch_shapes=[pltpu.VMEM((Bp, Ep), jnp.float32)],
        compiler_params=pltpu.CompilerParams(
            dimension_semantics=("arbitrary", "parallel"),
            vmem_limit_bytes=64 * 1024 * 1024),
        cost_estimate=cost,
    )(x_p, emb_p, w1_p, b1_p, w2_p, b2_p)

    # Padded batch rows / output lanes are sliced away here (pure layout).
    return out_padded[:B, :n_out]


def init_params(key, vocab_size, embedding_dim, hidden_size):
    k_emb, k_w1, k_b1, k_w2, k_b2 = jax.random.split(key, 5)
    # nn.Embedding default init ~ N(0, 1)
    emb = jax.random.normal(k_emb, (vocab_size, embedding_dim), jnp.float32)
    # nn.Linear default init ~ U(-1/sqrt(fan_in), 1/sqrt(fan_in)); stored (in, out)
    lim1 = 1.0 / jnp.sqrt(jnp.float32(embedding_dim))
    w1 = jax.random.uniform(k_w1, (embedding_dim, hidden_size), jnp.float32, -lim1, lim1)
    b1 = jax.random.uniform(k_b1, (hidden_size,), jnp.float32, -lim1, lim1)
    lim2 = 1.0 / jnp.sqrt(jnp.float32(hidden_size))
    w2 = jax.random.uniform(k_w2, (hidden_size, 2), jnp.float32, -lim2, lim2)
    b2 = jax.random.uniform(k_b2, (2,), jnp.float32, -lim2, lim2)
    return emb, w1, b1, w2, b2


def reference_forward(x, emb, w1, b1, w2, b2):
    embedded = emb[x]                      # (B, S, E)
    avg = embedded.mean(axis=1)            # (B, E)
    h = jax.nn.relu(avg @ w1 + b1)         # (B, H)
    return jax.nn.sigmoid(h @ w2 + b2)     # (B, 2)


if __name__ == "__main__":
    vocab_size, embedding_dim, hidden_size = 32, 16, 32
    batch, seq = 2, 8

    key = jax.random.PRNGKey(0)
    k_params, k_x = jax.random.split(key)
    emb, w1, b1, w2, b2 = init_params(k_params, vocab_size, embedding_dim, hidden_size)
    x = jax.random.randint(k_x, (batch, seq), 0, vocab_size, dtype=jnp.int32)

    params = prepare_params(emb, w1, b1, w2, b2)   # pad/cast once, reused per call
    out = nn2dan_forward(x, params)
    out = jax.block_until_ready(out)

    ref = reference_forward(x, emb, w1, b1, w2, b2)
    assert out.shape == (batch, 2), out.shape
    # bf16 MXU operands (f32 accumulation) => small deviation vs pure-f32 reference.
    assert jnp.allclose(out, ref, atol=1e-2), (out, ref)
    print("KERNEL_OK")
</pallas_src>

<mosaic_0001>
module attributes {stable_mosaic.version = 11 : i64} {
  func.func @dan_kernel(%arg0: i32, %arg1: i32, %arg2: memref<8x8xi32, #tpu.memory_space<vmem>>, %arg3: memref<128x128xbf16, #tpu.memory_space<vmem>>, %arg4: memref<128x128xbf16, #tpu.memory_space<vmem>>, %arg5: memref<1x128xf32, #tpu.memory_space<vmem>>, %arg6: memref<128x128xbf16, #tpu.memory_space<vmem>>, %arg7: memref<1x128xf32, #tpu.memory_space<vmem>>, %arg8: memref<8x128xf32, #tpu.memory_space<vmem>>, %arg9: memref<8x128xf32, #tpu.memory_space<vmem>>) attributes {dimension_semantics = [#tpu.dimension_semantics<arbitrary>, #tpu.dimension_semantics<parallel>], iteration_bounds = array<i64: 1, 1>, scalar_prefetch = 0 : i64, scratch_operands = 1 : i64, tpu.core_type = #tpu.core_type<tc>, window_params = [{transform_indices = @transform_0, window_bounds = array<i64: 8, 8>}, {transform_indices = @transform_1, window_bounds = array<i64: 128, 128>}, {pipeline_mode = #tpu.pipeline_mode<synchronous>, transform_indices = @transform_2, window_bounds = array<i64: 128, 128>}, {pipeline_mode = #tpu.pipeline_mode<synchronous>, transform_indices = @transform_3, window_bounds = array<i64: 1, 128>}, {pipeline_mode = #tpu.pipeline_mode<synchronous>, transform_indices = @transform_4, window_bounds = array<i64: 128, 128>}, {pipeline_mode = #tpu.pipeline_mode<synchronous>, transform_indices = @transform_5, window_bounds = array<i64: 1, 128>}, {transform_indices = @transform_6, window_bounds = array<i64: 8, 128>}]} {
    %c0 = arith.constant 0 : index
    %c0_0 = arith.constant 0 : index
    %0 = vector.load %arg2[%c0, %c0_0] : memref<8x8xi32, #tpu.memory_space<vmem>>, vector<8x8xi32>
    %c128_i32 = arith.constant 128 : i32
    %1 = arith.muli %arg0, %c128_i32 : i32
    %2 = vector.broadcast %1 : i32 to vector<8x8xi32>
    %3 = arith.subi %0, %2 : vector<8x8xi32>
    %4 = tpu.iota {dimensions = array<i32: 1>} : vector<1x128xi32>
    %cst = arith.constant 0.000000e+00 : f32
    %5 = vector.broadcast %cst : f32 to vector<8x128xf32>
    %6 = vector.extract_strided_slice %3 {offsets = [0, 0], sizes = [8, 1], strides = [1, 1]} : vector<8x8xi32> to vector<8x1xi32>
    %7 = vector.broadcast %6 : vector<8x1xi32> to vector<8x128xi32>
    %8 = vector.broadcast %4 : vector<1x128xi32> to vector<8x128xi32>
    %9 = arith.cmpi eq, %7, %8 : vector<8x128xi32>
    %10 = arith.extui %9 : vector<8x128xi1> to vector<8x128xi32>
    %11 = arith.sitofp %10 : vector<8x128xi32> to vector<8x128xf32>
    %12 = arith.addf %5, %11 : vector<8x128xf32>
    %13 = vector.extract_strided_slice %3 {offsets = [0, 1], sizes = [8, 1], strides = [1, 1]} : vector<8x8xi32> to vector<8x1xi32>
    %14 = vector.broadcast %13 : vector<8x1xi32> to vector<8x128xi32>
    %15 = vector.broadcast %4 : vector<1x128xi32> to vector<8x128xi32>
    %16 = arith.cmpi eq, %14, %15 : vector<8x128xi32>
    %17 = arith.extui %16 : vector<8x128xi1> to vector<8x128xi32>
    %18 = arith.sitofp %17 : vector<8x128xi32> to vector<8x128xf32>
    %19 = arith.addf %12, %18 : vector<8x128xf32>
    %20 = vector.extract_strided_slice %3 {offsets = [0, 2], sizes = [8, 1], strides = [1, 1]} : vector<8x8xi32> to vector<8x1xi32>
    %21 = vector.broadcast %20 : vector<8x1xi32> to vector<8x128xi32>
    %22 = vector.broadcast %4 : vector<1x128xi32> to vector<8x128xi32>
    %23 = arith.cmpi eq, %21, %22 : vector<8x128xi32>
    %24 = arith.extui %23 : vector<8x128xi1> to vector<8x128xi32>
    %25 = arith.sitofp %24 : vector<8x128xi32> to vector<8x128xf32>
    %26 = arith.addf %19, %25 : vector<8x128xf32>
    %27 = vector.extract_strided_slice %3 {offsets = [0, 3], sizes = [8, 1], strides = [1, 1]} : vector<8x8xi32> to vector<8x1xi32>
    %28 = vector.broadcast %27 : vector<8x1xi32> to vector<8x128xi32>
    %29 = vector.broadcast %4 : vector<1x128xi32> to vector<8x128xi32>
    %30 = arith.cmpi eq, %28, %29 : vector<8x128xi32>
    %31 = arith.extui %30 : vector<8x128xi1> to vector<8x128xi32>
    %32 = arith.sitofp %31 : vector<8x128xi32> to vector<8x128xf32>
    %33 = arith.addf %26, %32 : vector<8x128xf32>
    %34 = vector.extract_strided_slice %3 {offsets = [0, 4], sizes = [8, 1], strides = [1, 1]} : vector<8x8xi32> to vector<8x1xi32>
    %35 = vector.broadcast %34 : vector<8x1xi32> to vector<8x128xi32>
    %36 = vector.broadcast %4 : vector<1x128xi32> to vector<8x128xi32>
    %37 = arith.cmpi eq, %35, %36 : vector<8x128xi32>
    %38 = arith.extui %37 : vector<8x128xi1> to vector<8x128xi32>
    %39 = arith.sitofp %38 : vector<8x128xi32> to vector<8x128xf32>
    %40 = arith.addf %33, %39 : vector<8x128xf32>
    %41 = vector.extract_strided_slice %3 {offsets = [0, 5], sizes = [8, 1], strides = [1, 1]} : vector<8x8xi32> to vector<8x1xi32>
    %42 = vector.broadcast %41 : vector<8x1xi32> to vector<8x128xi32>
    %43 = vector.broadcast %4 : vector<1x128xi32> to vector<8x128xi32>
    %44 = arith.cmpi eq, %42, %43 : vector<8x128xi32>
    %45 = arith.extui %44 : vector<8x128xi1> to vector<8x128xi32>
    %46 = arith.sitofp %45 : vector<8x128xi32> to vector<8x128xf32>
    %47 = arith.addf %40, %46 : vector<8x128xf32>
    %48 = vector.extract_strided_slice %3 {offsets = [0, 6], sizes = [8, 1], strides = [1, 1]} : vector<8x8xi32> to vector<8x1xi32>
    %49 = vector.broadcast %48 : vector<8x1xi32> to vector<8x128xi32>
    %50 = vector.broadcast %4 : vector<1x128xi32> to vector<8x128xi32>
    %51 = arith.cmpi eq, %49, %50 : vector<8x128xi32>
    %52 = arith.extui %51 : vector<8x128xi1> to vector<8x128xi32>
    %53 = arith.sitofp %52 : vector<8x128xi32> to vector<8x128xf32>
    %54 = arith.addf %47, %53 : vector<8x128xf32>
    %55 = vector.extract_strided_slice %3 {offsets = [0, 7], sizes = [8, 1], strides = [1, 1]} : vector<8x8xi32> to vector<8x1xi32>
    %56 = vector.broadcast %55 : vector<8x1xi32> to vector<8x128xi32>
    %57 = vector.broadcast %4 : vector<1x128xi32> to vector<8x128xi32>
    %58 = arith.cmpi eq, %56, %57 : vector<8x128xi32>
    %59 = arith.extui %58 : vector<8x128xi1> to vector<8x128xi32>
    %60 = arith.sitofp %59 : vector<8x128xi32> to vector<8x128xf32>
    %61 = arith.addf %54, %60 : vector<8x128xf32>
    %62 = arith.truncf %61 : vector<8x128xf32> to vector<8x128xbf16>
    %c0_1 = arith.constant 0 : index
    %c0_2 = arith.constant 0 : index
    %63 = vector.load %arg3[%c0_1, %c0_2] : memref<128x128xbf16, #tpu.memory_space<vmem>>, vector<128x128xbf16>
    %cst_3 = arith.constant dense<0.000000e+00> : vector<8x128xf32>
    %64 = tpu.matmul %62, %63, %cst_3 {dimension_numbers = #tpu.dot_dimension_numbers<[1], [0], [0], [1], [0, 0, 1, 1], [], []>} : vector<8x128xbf16>, vector<128x128xbf16>, vector<8x128xf32> -> vector<8x128xf32>
    %c8_i32 = arith.constant 8 : i32
    %65 = arith.muli %arg1, %c8_i32 : i32
    %66 = tpu.assume_multiple %65, 8 : i32
    %c0_i32 = arith.constant 0 : i32
    %67 = arith.cmpi eq, %arg0, %c0_i32 : i32
    %68 = arith.extui %67 : i1 to i32
    %c0_i32_4 = arith.constant 0 : i32
    %69 = arith.cmpi ne, %68, %c0_i32_4 : i32
    scf.if %69 {
      %76 = arith.index_cast %66 : i32 to index
      %c0_9 = arith.constant 0 : index
      %77 = vector.load %arg9[%76, %c0_9] : memref<8x128xf32, #tpu.memory_space<vmem>>, vector<8x128xf32>
      tpu.vector_store %arg9[%76, %c0_9], %64 {strides = array<i32>} : memref<8x128xf32, #tpu.memory_space<vmem>>, vector<8x128xf32>,
    } else {
    }
    %c0_i32_5 = arith.constant 0 : i32
    %70 = arith.cmpi sgt, %arg0, %c0_i32_5 : i32
    %71 = arith.extui %70 : i1 to i32
    %c0_i32_6 = arith.constant 0 : i32
    %72 = arith.cmpi ne, %71, %c0_i32_6 : i32
    scf.if %72 {
      %76 = arith.index_cast %66 : i32 to index
      %c0_9 = arith.constant 0 : index
      %77 = vector.load %arg9[%76, %c0_9] : memref<8x128xf32, #tpu.memory_space<vmem>>, vector<8x128xf32>
      %78 = arith.addf %77, %64 : vector<8x128xf32>
      %79 = arith.index_cast %66 : i32 to index
      %c0_10 = arith.constant 0 : index
      %80 = vector.load %arg9[%79, %c0_10] : memref<8x128xf32, #tpu.memory_space<vmem>>, vector<8x128xf32>
      tpu.vector_store %arg9[%79, %c0_10], %78 {strides = array<i32>} : memref<8x128xf32, #tpu.memory_space<vmem>>, vector<8x128xf32>,
    } else {
    }
    %c0_i32_7 = arith.constant 0 : i32
    %73 = arith.cmpi eq, %arg0, %c0_i32_7 : i32
    %74 = arith.extui %73 : i1 to i32
    %c0_i32_8 = arith.constant 0 : i32
    %75 = arith.cmpi ne, %74, %c0_i32_8 : i32
    scf.if %75 {
      %76 = arith.index_cast %66 : i32 to index
      %c0_9 = arith.constant 0 : index
      %77 = vector.load %arg9[%76, %c0_9] : memref<8x128xf32, #tpu.memory_space<vmem>>, vector<8x128xf32>
      %cst_10 = arith.constant 1.250000e-01 : f32
      %78 = vector.broadcast %cst_10 : f32 to vector<8x128xf32>
      %79 = arith.mulf %77, %78 : vector<8x128xf32>
      %80 = arith.truncf %79 : vector<8x128xf32> to vector<8x128xbf16>
      %c0_11 = arith.constant 0 : index
      %c0_12 = arith.constant 0 : index
      %81 = vector.load %arg4[%c0_11, %c0_12] : memref<128x128xbf16, #tpu.memory_space<vmem>>, vector<128x128xbf16>
      %cst_13 = arith.constant dense<0.000000e+00> : vector<8x128xf32>
      %82 = tpu.matmul %80, %81, %cst_13 {dimension_numbers = #tpu.dot_dimension_numbers<[1], [0], [0], [1], [0, 0, 1, 1], [], []>} : vector<8x128xbf16>, vector<128x128xbf16>, vector<8x128xf32> -> vector<8x128xf32>
      %c0_14 = arith.constant 0 : index
      %c0_15 = arith.constant 0 : index
      %83 = vector.load %arg5[%c0_14, %c0_15] : memref<1x128xf32, #tpu.memory_space<vmem>>, vector<1x128xf32>
      %84 = vector.broadcast %83 : vector<1x128xf32> to vector<8x128xf32>
      %85 = arith.addf %82, %84 : vector<8x128xf32>
      %cst_16 = arith.constant 0.000000e+00 : f32
      %86 = vector.broadcast %cst_16 : f32 to vector<8x128xf32>
      %87 = arith.maximumf %85, %86 : vector<8x128xf32>
      %88 = arith.truncf %87 : vector<8x128xf32> to vector<8x128xbf16>
      %c0_17 = arith.constant 0 : index
      %c0_18 = arith.constant 0 : index
      %89 = vector.load %arg6[%c0_17, %c0_18] : memref<128x128xbf16, #tpu.memory_space<vmem>>, vector<128x128xbf16>
      %cst_19 = arith.constant dense<0.000000e+00> : vector<8x128xf32>
      %90 = tpu.matmul %88, %89, %cst_19 {dimension_numbers = #tpu.dot_dimension_numbers<[1], [0], [0], [1], [0, 0, 1, 1], [], []>} : vector<8x128xbf16>, vector<128x128xbf16>, vector<8x128xf32> -> vector<8x128xf32>
      %c0_20 = arith.constant 0 : index
      %c0_21 = arith.constant 0 : index
      %91 = vector.load %arg7[%c0_20, %c0_21] : memref<1x128xf32, #tpu.memory_space<vmem>>, vector<1x128xf32>
      %92 = vector.broadcast %91 : vector<1x128xf32> to vector<8x128xf32>
      %93 = arith.addf %90, %92 : vector<8x128xf32>
      %94 = arith.negf %93 : vector<8x128xf32>
      %95 = math.exp %94 : vector<8x128xf32>
      %cst_22 = arith.constant 1.000000e+00 : f32
      %96 = vector.broadcast %cst_22 : f32 to vector<8x128xf32>
      %97 = arith.addf %96, %95 : vector<8x128xf32>
      %98 = arith.divf %96, %97 : vector<8x128xf32>
      %c0_23 = arith.constant 0 : index
      %c0_24 = arith.constant 0 : index
      %99 = vector.load %arg8[%c0_23, %c0_24] : memref<8x128xf32, #tpu.memory_space<vmem>>, vector<8x128xf32>
      tpu.vector_store %arg8[%c0_23, %c0_24], %98 {strides = array<i32>} : memref<8x128xf32, #tpu.memory_space<vmem>>, vector<8x128xf32>,
    } else {
    }
    return
  }
  func.func @transform_0(%arg0: i32, %arg1: i32) -> (i32, i32) {
    %c0_i32 = arith.constant 0 : i32
    %c0_i32_0 = arith.constant 0 : i32
    return %arg1, %c0_i32 : i32, i32
  }
  func.func @transform_1(%arg0: i32, %arg1: i32) -> (i32, i32) {
    %c0_i32 = arith.constant 0 : i32
    %c0_i32_0 = arith.constant 0 : i32
    return %arg0, %c0_i32 : i32, i32
  }
  func.func @transform_2(%arg0: i32, %arg1: i32) -> (i32, i32) {
    %c0_i32 = arith.constant 0 : i32
    %c0_i32_0 = arith.constant 0 : i32
    %c0_i32_1 = arith.constant 0 : i32
    return %c0_i32, %c0_i32_0 : i32, i32
  }
  func.func @transform_3(%arg0: i32, %arg1: i32) -> (i32, i32) {
    %c0_i32 = arith.constant 0 : i32
    %c0_i32_0 = arith.constant 0 : i32
    %c0_i32_1 = arith.constant 0 : i32
    return %c0_i32, %c0_i32_0 : i32, i32
  }
  func.func @transform_4(%arg0: i32, %arg1: i32) -> (i32, i32) {
    %c0_i32 = arith.constant 0 : i32
    %c0_i32_0 = arith.constant 0 : i32
    %c0_i32_1 = arith.constant 0 : i32
    return %c0_i32, %c0_i32_0 : i32, i32
  }
  func.func @transform_5(%arg0: i32, %arg1: i32) -> (i32, i32) {
    %c0_i32 = arith.constant 0 : i32
    %c0_i32_0 = arith.constant 0 : i32
    %c0_i32_1 = arith.constant 0 : i32
    return %c0_i32, %c0_i32_0 : i32, i32
  }
  func.func @transform_6(%arg0: i32, %arg1: i32) -> (i32, i32) {
    %c0_i32 = arith.constant 0 : i32
    %c0_i32_0 = arith.constant 0 : i32
    return %arg1, %c0_i32 : i32, i32
  }
}

</mosaic_0001>

<bundles_post_ra>
// kernel: tpu_custom_call.1
= control target key start
LH: loop header
LB: loop body
LE: loop exit
PB: predicated region body
PF: predicated region fallthrough
CT: control target
= control target key end

     0   :  { %11 = vsyncpa [#allocation4], 0  ;;  %s919_s0 = inlined_call_operand.hbm [shape: s32[8,8], index: 0, kind: input, shape index: {}]   ;;  %s920_s1 = inlined_call_operand.hbm [shape: bf16[128,128], index: 1, kind: input, shape index: {}]   ;;  %s921_s2 = inlined_call_operand.hbm [shape: bf16[128,128], index: 2, kind: input, shape index: {}]   ;;  %s922_s3 = inlined_call_operand.vmem [shape: f32[1,128], index: 3, kind: input, shape index: {}]   ;;  %s923_s4 = inlined_call_operand.hbm [shape: bf16[128,128], index: 4, kind: input, shape index: {}]   ;;  %s924_s5 = inlined_call_operand.vmem [shape: f32[1,128], index: 5, kind: input, shape index: {}]   ;;  %s925_s6 = inlined_call_operand.hbm [shape: f32[8,128], index: 6, kind: output, shape index: {}]  }
   0x1   :  { %12 = vsyncpa [#allocation7], 0 }
   0x2   :  { %13 = vsyncpa [#allocation10], 0 }
   0x3   :  { %14 = vsyncpa [#allocation5], 0  ;;  %s799_s21 = smov [#allocation6]  }
   0x4   :  { %s30_s22 = sshll.u32 %s799_s21, 4  ;;  %s31_s22 = int_to_ptr.vmem [resolvable:$true] %s30_s22 }
   0x5   :  { %s699_s23 = scalar_lea.vmem %s31_s22, 1024  ;;  %p704_p1 = scmp.lt.s32.totalorder %s31_s22, %s31_s22 }
   0x6   :  { %p700_p0 = scmp.ne.s32.totalorder %s31_s22, %s699_s23  ;;  %p705_p2 = scmp.lt.s32.totalorder %s699_s23, %s699_s23 }
   0x8   :  { %p706_p3 = por %p705_p2, %p704_p1 }
   0xa   :  { %p707_p4 = pnand %p706_p3, %p700_p0 }
   0xc   :  { %710 = shalt.err (!%p707_p4)
}
   0xd   :  { %s800_s24 = smov 64   ;;  %s801_s25 = smov 4  }
   0xe   :  { %36 = dma.hbm_to_vmem [thread:$0]  %s920_s1, 1024, %s31_s22, [#allocation7], %s800_s24, %s800_s24, %s801_s25  }
   0xf   :  { %s802_s28 = smov [#allocation3]   ;;  %s803_s30 = smov [#allocation8]  }
  0x10   :  { %s21_s29 = sshll.u32 %s802_s28, 4  ;;  %s42_s7 = sshll.u32 %s803_s30, 4  ;;  %s22_s29 = int_to_ptr.vmem [resolvable:$true] %s21_s29  ;;  %s43_s7 = int_to_ptr.vmem [resolvable:$true] %s42_s7 }
  0x11   :  { %s719_s8 = scalar_lea.vmem %s22_s29, 128  ;;  %p724_p6 = scmp.lt.s32.totalorder %s22_s29, %s22_s29 }
  0x12   :  { %p720_p5 = scmp.ne.s32.totalorder %s22_s29, %s719_s8  ;;  %p725_p7 = scmp.lt.s32.totalorder %s719_s8, %s719_s8 }
  0x14   :  { %p726_p8 = por %p725_p7, %p724_p6 }
  0x16   :  { %p727_p9 = pnand %p726_p8, %p720_p5 }
  0x18   :  { %730 = shalt.err (!%p727_p9)
}
  0x19   :  { %24 = dma.hbm_to_vmem [thread:$0]  %s919_s0, 128, %s22_s29, [#allocation4]  }
  0x1a   :  { %s739_s11 = scalar_lea.vmem %s43_s7, 1024  ;;  %p744_p11 = scmp.lt.s32.totalorder %s43_s7, %s43_s7 }
  0x1b   :  { %p740_p10 = scmp.ne.s32.totalorder %s43_s7, %s739_s11  ;;  %p745_p12 = scmp.lt.s32.totalorder %s739_s11, %s739_s11 }
  0x1d   :  { %p746_p13 = por %p745_p12, %p744_p11 }
  0x1f   :  { %p747_p0 = pnand %p746_p13, %p740_p10 }
  0x21   :  { %750 = shalt.err (!%p747_p0)
}
  0x22   :  { %48 = dma.hbm_to_vmem [thread:$0]  %s921_s2, 1024, %s43_s7, [#allocation7], %s800_s24, %s800_s24, %s801_s25  }
  0x23   :  { %s804_s13 = smov [#allocation9]  }
  0x24   :  { %s56_s14 = sshll.u32 %s804_s13, 4  ;;  %s57_s14 = int_to_ptr.vmem [resolvable:$true] %s56_s14 }
  0x25   :  { %s759_s15 = scalar_lea.vmem %s57_s14, 1024  ;;  %p764_p2 = scmp.lt.s32.totalorder %s57_s14, %s57_s14 }
  0x26   :  { %p760_p1 = scmp.ne.s32.totalorder %s57_s14, %s759_s15  ;;  %p765_p3 = scmp.lt.s32.totalorder %s759_s15, %s759_s15 }
  0x28   :  { %p766_p4 = por %p765_p3, %p764_p2 }
  0x2a   :  { %p767_p5 = pnand %p766_p4, %p760_p1 }
  0x2c   :  { %770 = shalt.err (!%p767_p5)
}
  0x2d   :  { %62 = dma.hbm_to_vmem [thread:$0]  %s923_s4, 1024, %s57_s14, [#allocation10], %s800_s24, %s800_s24, %s801_s25  }
  0x2e   :  { %791 = dma.done.wait [#allocation4], 128  }
  0x2f   :  { %792 = vsyncadd [#allocation4], 4294967168 }
  0x30   :  { %793 = dma.done.wait [#allocation7], 2048  }
  0x31   :  { %794 = vsyncadd [#allocation7], 4294965248 }
  0x32   :  { %795 = dma.done.wait [#allocation10], 1024  }
  0x33   :  { %796 = vsyncadd [#allocation10], 4294966272  ;;  %v805_v0 = vmov 2   ;;  %v806_v1 = vmov 0   ;;  %v807_v2 = vmov 0.0   ;;  %v78_v3 = vld [vmem:[#allocation3] sm:$0xff]  ;;  %v82_v25 = vlaneseq }
  0x34   :  { %656 = vset.pattern.permute.xlu1 %v805_v0  ;;  %654 = vset.pattern.permute.xlu0 %v806_v1  ;;  %v663_v4 = vld [vmem:[#allocation6 + $0x38] sm:$0xff]   ;;  %v664_v5 = vld [vmem:[#allocation6 + $0x30] sm:$0xff]   ;;  %v808_v6 = vmov 3   ;;  %v809_v7 = vmov 1   ;;  %v665_v8 = vld [vmem:[#allocation6 + $0x28] sm:$0xff]   ;;  %v810_v9 = vmov 4  }
  0x35   :  { %577 = vmatprep.subr.bf16.mxu0 %v807_v2  ;;  %597 = vmatprep.subr.bf16.mxu1 %v807_v2  ;;  %v811_v10 = vmov 5   ;;  %v666_v11 = vld [vmem:[#allocation6 + $0x20] sm:$0xff]   ;;  %v667_v12 = vld [vmem:[#allocation6 + $0x18] sm:$0xff]   ;;  %v812_v13 = vmov 6   ;;  %v813_v14 = vmov 7   ;;  %v668_v15 = vld [vmem:[#allocation6 + $0x10] sm:$0xff]  }
  0x36   :  { %99 = vperm.xlu1 %656, %v78_v3   ;;  %85 = vperm.xlu0 %654, %v78_v3   ;;  %vm814_vm0 = vmmov 0   ;;  %v671_v16 = vld [vmem:[#allocation8 + $0x38] sm:$0xff]   ;;  %v669_v17 = vld [vmem:[#allocation6 + $0x8] sm:$0xff]   ;;  %v672_v18 = vld [vmem:[#allocation8 + $0x30] sm:$0xff]   ;;  %v83_v28 = vand.u32 127, %v82_v25 }
  0x37   :  { %578 = vmatpush3.bf16.msra.mxu0 %v663_v4  ;;  %593 = vmatprep.mubr.msk.bf16.mxu0 %vm814_vm0, %v807_v2  ;;  %v670_v19 = vld [vmem:[#allocation6] sm:$0xff]   ;;  %v673_v20 = vld [vmem:[#allocation8 + $0x28] sm:$0xff]   ;;  %v675_v22 = vld [vmem:[#allocation8 + $0x18] sm:$0xff]  }
  0x38   :  { %579 = vmatprep.subr.bf16.mxu0 %v807_v2  ;;  %613 = vmatprep.mubr.msk.bf16.mxu1 %vm814_vm0, %v807_v2  ;;  %v674_v21 = vld [vmem:[#allocation8 + $0x20] sm:$0xff]   ;;  %v676_v23 = vld [vmem:[#allocation8 + $0x10] sm:$0xff]   ;;  %v677_v24 = vld [vmem:[#allocation8 + $0x8] sm:$0xff]  }
  0x39   :  { %598 = vmatpush3.bf16.msra.mxu1 %v671_v16  ;;  %v678_v51 = vld [vmem:[#allocation8] sm:$0xff]   ;;  %v679_v52 = vld [vmem:[#allocation9 + $0x38] sm:$0xff]   ;;  %v680_v53 = vld [vmem:[#allocation9 + $0x30] sm:$0xff]  }
  0x3a   :  { %657 = vset.pattern.permute.xlu1 %v808_v6  ;;  %655 = vset.pattern.permute.xlu0 %v809_v7  ;;  %v681_v54 = vld [vmem:[#allocation9 + $0x28] sm:$0xff]   ;;  %v682_v55 = vld [vmem:[#allocation9 + $0x20] sm:$0xff]   ;;  %v683_v56 = vld [vmem:[#allocation9 + $0x18] sm:$0xff]  }
  0x3b   :  { %106 = vperm.xlu1 %657, %v78_v3   ;;  %92 = vperm.xlu0 %655, %v78_v3   ;;  %v684_v57 = vld [vmem:[#allocation9 + $0x10] sm:$0xff]   ;;  %v685_v0 = vld [vmem:[#allocation9 + $0x8] sm:$0xff]   ;;  %v686_v1 = vld [vmem:[#allocation9] sm:$0xff]  }
  0x3c   :  { %580 = vmatpush3.bf16.msra.mxu0 %v664_v5  ;;  %599 = vmatprep.subr.bf16.mxu1 %v807_v2 }
  0x3d   :  { %581 = vmatprep.subr.bf16.mxu0 %v807_v2  ;;  %600 = vmatpush3.bf16.msra.mxu1 %v672_v18 }
  0x3e   :  { %601 = vmatprep.subr.bf16.mxu1 %v807_v2 }
  0x3f   :  { %658 = vset.pattern.permute.xlu1 %v810_v9  ;;  %659 = vset.pattern.permute.xlu0 %v811_v10 }
  0x40   :  { %113 = vperm.xlu1 %658, %v78_v3   ;;  %120 = vperm.xlu0 %659, %v78_v3  }
  0x41   :  { %582 = vmatpush3.bf16.msra.mxu0 %v665_v8  ;;  %602 = vmatpush3.bf16.msra.mxu1 %v673_v20 }
  0x42   :  { %583 = vmatprep.subr.bf16.mxu0 %v807_v2  ;;  %603 = vmatprep.subr.bf16.mxu1 %v807_v2 }
  0x44   :  { %660 = vset.pattern.permute.xlu1 %v812_v13  ;;  %662 = vset.pattern.permute.xlu0 %v813_v14 }
  0x45   :  { %127 = vperm.xlu1 %660, %v78_v3   ;;  %584 = vmatpush3.bf16.msra.mxu0 %v666_v11  ;;  %v540_v11 = vld [vmem:[%s924_s5] ss:$0 sm:$0xff] }
  0x46   :  { %585 = vmatprep.subr.bf16.mxu0 %v807_v2  ;;  %604 = vmatpush3.bf16.msra.mxu1 %v674_v21 }
  0x47   :  { %605 = vmatprep.subr.bf16.mxu1 %v807_v2 }
  0x49   :  { %661 = vset.pattern.permute.xlu1 %v813_v14  ;;  %586 = vmatpush3.bf16.msra.mxu0 %v667_v12 }
  0x4a   :  { %134 = vperm.xlu1 %661, %v78_v3   ;;  %587 = vmatprep.subr.bf16.mxu0 %v807_v2  ;;  %v531_v3 = vld [vmem:[%s922_s3] ss:$0 sm:$0xff]  ;;  %s815_s3 = smov [#allocation11]  }
  0x4b   :  { %606 = vmatpush3.bf16.msra.mxu1 %v675_v22  ;;  %s504_s19 = sshll.u32 %s815_s3, 4  ;;  %s505_s19 = int_to_ptr.vmem [resolvable:$true] %s504_s19 }
  0x4c   :  { %607 = vmatprep.subr.bf16.mxu1 %v807_v2  ;;  %s771_s20 = scalar_lea.vmem %s505_s19, 128  ;;  %p776_p7 = scmp.lt.s32.totalorder %s505_s19, %s505_s19 }
  0x4d   :  { %588 = vmatpush3.bf16.msra.mxu0 %v668_v15  ;;  %p772_p6 = scmp.ne.s32.totalorder %s505_s19, %s771_s20  ;;  %p777_p8 = scmp.lt.s32.totalorder %s771_s20, %s771_s20 }
  0x4e   :  { %589 = vmatprep.subr.bf16.mxu0 %v807_v2 }
  0x4f   :  { %608 = vmatpush3.bf16.msra.mxu1 %v676_v23  ;;  %p778_p9 = por %p777_p8, %p776_p7 }
  0x50   :  { %609 = vmatprep.subr.bf16.mxu1 %v807_v2 }
  0x51   :  { %590 = vmatpush3.bf16.msra.mxu0 %v669_v17  ;;  %p779_p10 = pnand %p778_p9, %p772_p6 }
  0x52   :  { %591 = vmatprep.subr.bf16.mxu0 %v807_v2 }
  0x53   :  { %610 = vmatpush3.bf16.msra.mxu1 %v677_v24 }
  0x54   :  { %611 = vmatprep.subr.bf16.mxu1 %v807_v2 }
  0x55   :  { %592 = vmatpush3.bf16.msra.mxu0 %v670_v19 }
  0x56   :  { %617 = vmatprep.subr.bf16.mxu0 %v807_v2 }
  0x57   :  { %612 = vmatpush3.bf16.msra.mxu1 %v678_v51 }
  0xb1   :  { %v100_v26 = vpop.permute.xlu1 %99  ;;  %v86_v27 = vpop.permute.xlu0 %85 }
  0xb2   :  { %vm87_vm1 = vcmp.eq.s32.totalorder %v86_v27, %v83_v28  ;;  %vm101_vm2 = vcmp.eq.s32.totalorder %v100_v26, %v83_v28 }
  0xb3   :  { %v515_v31 = vsel %vm87_vm1, 1.0, %v807_v2  ;;  %v517_v34 = vsel %vm101_vm2, 1.0, %v807_v2 }
  0xb6   :  { %v107_v29 = vpop.permute.xlu1 %106  ;;  %v93_v30 = vpop.permute.xlu0 %92 }
  0xb7   :  { %vm94_vm3 = vcmp.eq.s32.totalorder %v93_v30, %v83_v28  ;;  %vm108_vm4 = vcmp.eq.s32.totalorder %v107_v29, %v83_v28 }
  0xb8   :  { %v516_v32 = vsel %vm94_vm3, 1.0, %v807_v2  ;;  %v518_v38 = vsel %vm108_vm4, 1.0, %v807_v2 }
  0xb9   :  { %v97_v33 = vadd.f32 %v516_v32, %v515_v31 }
  0xbb   :  { %v104_v35 = vadd.f32 %v517_v34, %v97_v33  ;;  %v114_v36 = vpop.permute.xlu1 %113  ;;  %v121_v37 = vpop.permute.xlu0 %120 }
  0xbc   :  { %vm115_vm5 = vcmp.eq.s32.totalorder %v114_v36, %v83_v28  ;;  %vm122_vm6 = vcmp.eq.s32.totalorder %v121_v37, %v83_v28 }
  0xbd   :  { %v111_v39 = vadd.f32 %v518_v38, %v104_v35  ;;  %v519_v40 = vsel %vm115_vm5, 1.0, %v807_v2  ;;  %v520_v42 = vsel %vm122_vm6, 1.0, %v807_v2 }
  0xbf   :  { %v118_v41 = vadd.f32 %v519_v40, %v111_v39 }
  0xc0   :  { %v128_v43 = vpop.permute.xlu1 %127 }
  0xc1   :  { %vm129_vm7 = vcmp.eq.s32.totalorder %v128_v43, %v83_v28  ;;  %v125_v44 = vadd.f32 %v520_v42, %v118_v41 }
  0xc2   :  { %v521_v45 = vsel %vm129_vm7, 1.0, %v807_v2 }
  0xc3   :  { %v132_v47 = vadd.f32 %v521_v45, %v125_v44 }
  0xc5   :  { %v135_v46 = vpop.permute.xlu1 %134 }
  0xc6   :  { %vm136_vm8 = vcmp.eq.s32.totalorder %v135_v46, %v83_v28 }
  0xc7   :  { %v522_v48 = vsel %vm136_vm8, 1.0, %v807_v2 }
  0xc8   :  { %v139_v49 = vadd.f32 %v522_v48, %v132_v47 }
  0xca   :  { %v140_v50 = vpack.c.bf16 %v139_v49, %v139_v49 }
  0xcc   :  { %594 = vmatmul.mubr.bf16.vlgmr.msra.gmra.mxu0 %v140_v50 }
  0xcd   :  { %633 = vmatprep.mubr.msk.bf16.mxu0 %vm814_vm0, %v807_v2  ;;  %618 = vmatpush3.bf16.msra.mxu0 %v679_v52 }
  0xce   :  { %619 = vmatprep.subr.bf16.mxu0 %v807_v2 }
  0xd1   :  { %620 = vmatpush3.bf16.msra.mxu0 %v680_v53 }
  0xd2   :  { %621 = vmatprep.subr.bf16.mxu0 %v807_v2 }
  0xd5   :  { %622 = vmatpush3.bf16.msra.mxu0 %v681_v54 }
  0xd6   :  { %623 = vmatprep.subr.bf16.mxu0 %v807_v2 }
  0xd9   :  { %624 = vmatpush3.bf16.msra.mxu0 %v682_v55 }
  0xda   :  { %625 = vmatprep.subr.bf16.mxu0 %v807_v2 }
  0xdd   :  { %626 = vmatpush3.bf16.msra.mxu0 %v683_v56 }
  0xde   :  { %627 = vmatprep.subr.bf16.mxu0 %v807_v2 }
  0xe1   :  { %628 = vmatpush3.bf16.msra.mxu0 %v684_v57 }
  0xe2   :  { %629 = vmatprep.subr.bf16.mxu0 %v807_v2 }
  0xe5   :  { %630 = vmatpush3.bf16.msra.mxu0 %v685_v0 }
  0xe6   :  { %631 = vmatprep.subr.bf16.mxu0 %v807_v2 }
  0xe9   :  { %632 = vmatpush3.bf16.msra.mxu0 %v686_v1 }
 0x18c   :  { %v239_v58 = vpop.f32.mrf.mxu0 }
 0x18d   :  { %v265_v59 = vmul.f32 0.125, %v239_v58 }
 0x18e   :  { %v595_v60 = vpop.f32.mrf.mxu0 }
 0x18f   :  { %v266_v61 = vpack.c.bf16 %v265_v59, %v265_v59 }
 0x190   :  { %v242_v62 = vpop.f32.mrf.mxu0 }
 0x191   :  { %614 = vmatmul.mubr.bf16.vlgmr.msra.gmra.mxu1 %v266_v61 }
 0x192   :  { %v596_v63 = vpop.f32.mrf.mxu0 }
 0x251   :  { %v372_v4 = vpop.f32.mrf.mxu1 }
 0x252   :  { %v373_v5 = vadd.f32 %v531_v3, %v372_v4 }
 0x253   :  { %v615_v6 = vpop.f32.mrf.mxu1 }
 0x254   :  { %v378_v7 = vmax.f32 %v373_v5, 0.0 }
 0x255   :  { %v375_v8 = vpop.f32.mrf.mxu1 }
 0x256   :  { %v379_v9 = vpack.c.bf16 %v378_v7, %v378_v7 }
 0x257   :  { %v616_v10 = vpop.f32.mrf.mxu1 }
 0x258   :  { %634 = vmatmul.mubr.bf16.vlgmr.msra.gmra.mxu0 %v379_v9 }
 0x318   :  { %v485_v12 = vpop.f32.mrf.mxu0 }
 0x319   :  { %v486_v2 = vadd.f32 %v540_v11, %v485_v12 }
 0x31a   :  { %v635_v13 = vpop.f32.mrf.mxu0 }
 0x31b   :  { %v549_v14 = vmul.f32 -1.442695, %v486_v2 }
 0x31c   :  { %v488_v15 = vpop.f32.mrf.mxu0 }
 0x31d   :  { %687 = vpow2.f32 %v549_v14 }
 0x31e   :  { %v636_v16 = vpop.f32.mrf.mxu0 }
 0x32a   :  { %v688_v17 = vpop.eup %687 }
 0x32b   :  { %v494_v18 = vadd.f32 1.0, %v688_v17 }
 0x32d   :  { %689 = vrcp.f32 %v494_v18 }
 0x33a   :  { %v690_v19 = vpop.eup %689 }
 0x33b   :  { %497 = vst [vmem:[#allocation11] sm:$0xff] %v690_v19 }
 0x33c   :  { %782 = shalt.err (!%p779_p10)
}
 0x33d   :  { %507 = dma.vmem_to_hbm [thread:$0]  %s505_s19, 128, %s925_s6, [#allocation5]  }
 0x33e   :  { %797 = dma.done.wait [#allocation5], 128  }
 0x33f   :  { %798 = vsyncadd [#allocation5], 4294967168 }
 0x340   :  { %511 = vsyncpa [#allocation4], 1 }
 0x341   :  { %512 = vsyncpa [#allocation7], 1 }
 0x342   :  { %513 = vsyncpa [#allocation10], 1 }
 0x343   :  { %514 = vsyncpa [#allocation5], 1 }

</bundles_post_ra>
